<compile_context>
chip_gen: v6e
topology: v6e:2x2x1
jax: 0.10.0
libtpu: 0.0.40
codegen_flags: <defaults>
</compile_context>

<pallas_src>
import jax
import jax.numpy as jnp
from jax.experimental import pallas as pl
from jax.experimental.pallas import tpu as pltpu


def _round_up(x, m):
    return ((x + m - 1) // m) * m


def _choose_tile_size(S, C, logit_bytes):
    """Pick the spatial tile (lane) width from a VMEM budget."""
    budget = 8 * 1024 * 1024  # bytes for the double-buffered block pipeline
    # per spatial lane, double buffered: logits in + int8 target in + f32 CE out
    per_lane = 2 * (C * logit_bytes + 1 + 4)
    ts = budget // per_lane
    ts = min(ts, 65536, _round_up(S, 128))
    ts = max(128, (ts // 128) * 128)
    return int(ts)


def _make_dc_topk_kernel(s_orig: int, ts: int, num_tiles: int):
    """Kernel closure over static spatial size / tile size (for masking)."""
    has_partial = (s_orig % ts) != 0

    def kernel(logits_ref, target_ref, ce_ref, stats_ref,
               tp_acc, ps_acc, cc_acc):
        # Block shapes: logits (1, C, TS), target (1, 1, TS) int8,
        #               ce (1, 1, TS) f32, stats (1, C, 3) f32
        # Scratch:      tp_acc / ps_acc / cc_acc : (C, 1) f32 accumulators
        s = pl.program_id(1)
        nt = pl.num_programs(1)

        @pl.when(s == 0)
        def _init():
            tp_acc[...] = jnp.zeros_like(tp_acc)
            ps_acc[...] = jnp.zeros_like(ps_acc)
            cc_acc[...] = jnp.zeros_like(cc_acc)

        def tile_work(masked: bool):
            logits = logits_ref[0].astype(jnp.float32)       # (C, TS)
            tgt = target_ref[0].astype(jnp.int32)            # (1, TS)
            C = logits.shape[0]

            if masked:
                lane = jax.lax.broadcasted_iota(jnp.int32, (1, ts), 1)
                valid = (s * ts + lane) < s_orig             # (1, TS) bool
                # Neutralize garbage lanes of the clipped edge block before
                # any math (keeps exp/softmax finite).
                logits = jnp.where(valid, logits, 0.0)

            # --- softmax over channel axis (softmax_helper_dim1), exact ---
            m = jnp.max(logits, axis=0, keepdims=True)       # (1, TS)
            e = jnp.exp(logits - m)                          # (C, TS)
            denom = jnp.sum(e, axis=0, keepdims=True)        # (1, TS)
            probs = e / denom                                # exact division
            logz = jnp.log(denom) + m                        # log-sum-exp

            # --- one-hot target via iota compare ---
            cls = jax.lax.broadcasted_iota(jnp.int32, (C, ts), 0)
            onehot_b = cls == tgt
            if masked:
                onehot_b = onehot_b & valid
            onehot = onehot_b.astype(jnp.float32)            # (C, TS)

            # --- per-voxel cross entropy: logsumexp - logit[target] ---
            sel_logit = jnp.sum(onehot * logits, axis=0, keepdims=True)
            ce_ref[0] = logz - sel_logit        # OOB lanes of edge block dropped

            # --- dice statistics accumulated in VMEM scratch ---
            if masked:
                ps_acc[...] += jnp.sum(probs * valid.astype(jnp.float32),
                                       axis=1, keepdims=True)
            else:
                ps_acc[...] += jnp.sum(probs, axis=1, keepdims=True)
            tp_acc[...] += jnp.sum(probs * onehot, axis=1, keepdims=True)
            cc_acc[...] += jnp.sum(onehot, axis=1, keepdims=True)

        if not has_partial:
            tile_work(False)
        elif num_tiles == 1:
            tile_work(True)
        else:
            @pl.when(s < nt - 1)
            def _full():
                tile_work(False)

            @pl.when(s == nt - 1)
            def _part():
                tile_work(True)

        # Assemble + write the stats block once per batch element.
        @pl.when(s == nt - 1)
        def _finalize():
            stats_ref[0] = jnp.concatenate(
                [tp_acc[...], ps_acc[...], cc_acc[...]], axis=1)  # (C, 3)

    return kernel


def dc_and_topk_loss(net_output, target, *, weight_ce=1.0, weight_dice=1.0,
                     k=10.0, batch_dice=False, do_bg=False, smooth=1e-5):
    """net_output: (B, C, *spatial) float; target: (B, 1, *spatial) int labels."""
    B, C = net_output.shape[0], net_output.shape[1]
    spatial = net_output.shape[2:]
    S = 1
    for d in spatial:
        S *= d

    logits = net_output.reshape(B, C, S)                 # native dtype on the wire
    tgt = target.reshape(B, 1, S).astype(jnp.int8)       # narrow target traffic

    logit_bytes = jnp.dtype(net_output.dtype).itemsize
    TS = _choose_tile_size(S, C, logit_bytes)
    num_tiles = pl.cdiv(S, TS)

    kernel = _make_dc_topk_kernel(S, TS, num_tiles)

    ce_px, stats = pl.pallas_call(
        kernel,
        out_shape=(
            jax.ShapeDtypeStruct((B, 1, S), jnp.float32),   # per-voxel CE (exact f32)
            jax.ShapeDtypeStruct((B, C, 3), jnp.float32),   # [tp, prob_sum, count]
        ),
        grid_spec=pltpu.PrefetchScalarGridSpec(
            num_scalar_prefetch=0,
            grid=(B, num_tiles),
            in_specs=[
                pl.BlockSpec((1, C, TS), lambda b, s: (b, 0, s)),
                pl.BlockSpec((1, 1, TS), lambda b, s: (b, 0, s)),
            ],
            out_specs=[
                pl.BlockSpec((1, 1, TS), lambda b, s: (b, 0, s)),
                # resident accumulator block: one HBM write per batch element
                pl.BlockSpec((1, C, 3), lambda b, s: (b, 0, 0)),
            ],
            scratch_shapes=[
                pltpu.VMEM((C, 1), jnp.float32),   # tp
                pltpu.VMEM((C, 1), jnp.float32),   # prob_sum
                pltpu.VMEM((C, 1), jnp.float32),   # class count
            ],
        ),
        compiler_params=pltpu.CompilerParams(
            dimension_semantics=("parallel", "arbitrary")),
    )(logits, tgt)

    # ---------------- TopK cross-entropy ----------------
    num_voxels = B * S
    k_count = max(int(num_voxels * k / 100.0), 1)

    ce_rows = ce_px.reshape(B, S)
    kk = min(k_count, S)
    if B > 1 and kk < S:
        # Exact hierarchical selection: each batch row contributes at most
        # min(k_count, S) elements to the global top-k, so a per-row prefilter
        # followed by a merge is lossless and shrinks the global sort.
        cand = jax.lax.top_k(ce_rows, kk)[0].reshape(-1)
        topk_vals, _ = jax.lax.top_k(cand, k_count)
    else:
        topk_vals, _ = jax.lax.top_k(ce_rows.reshape(-1), k_count)
    ce_loss = jnp.mean(topk_vals)

    # ---------------- Soft Dice ----------------
    tp = stats[:, :, 0]          # (B, C)
    prob_sum = stats[:, :, 1]
    cls_count = stats[:, :, 2]
    fp = prob_sum - tp
    fn = cls_count - tp
    if batch_dice:
        tp, fp, fn = tp.sum(0), fp.sum(0), fn.sum(0)
    nominator = 2.0 * tp + smooth
    denominator = jnp.maximum(2.0 * tp + fp + fn + smooth, 1e-8)
    dc = nominator / denominator
    if not do_bg:
        dc = dc[1:] if batch_dice else dc[:, 1:]
    dc_loss = -jnp.mean(dc)

    return weight_ce * ce_loss + weight_dice * dc_loss


if __name__ == "__main__":
    key = jax.random.PRNGKey(0)
    k1, k2 = jax.random.split(key)

    B, C, H, W = 2, 4, 16, 16
    net_output = jax.random.normal(k1, (B, C, H, W), dtype=jnp.float32)
    target = jax.random.randint(k2, (B, 1, H, W), 0, C, dtype=jnp.int32)

    loss = dc_and_topk_loss(net_output, target)
    loss = jax.block_until_ready(loss)
    assert jnp.isfinite(loss), "loss is not finite"
    print("KERNEL_OK")
</pallas_src>

<mosaic_0001>
module attributes {stable_mosaic.version = 11 : i64} {
  func.func @kernel(%arg0: i32, %arg1: i32, %arg2: memref<1x4x256xf32, #tpu.memory_space<vmem>>, %arg3: memref<1x1x256xi8, #tpu.memory_space<vmem>>, %arg4: memref<1x1x256xf32, #tpu.memory_space<vmem>>, %arg5: memref<1x4x3xf32, #tpu.memory_space<vmem>>, %arg6: memref<4x1xf32, #tpu.memory_space<vmem>>, %arg7: memref<4x1xf32, #tpu.memory_space<vmem>>, %arg8: memref<4x1xf32, #tpu.memory_space<vmem>>) attributes {dimension_semantics = [#tpu.dimension_semantics<parallel>, #tpu.dimension_semantics<arbitrary>], iteration_bounds = array<i64: 2, 1>, scalar_prefetch = 0 : i64, scratch_operands = 3 : i64, tpu.core_type = #tpu.core_type<tc>, window_params = [{transform_indices = @transform_0, window_bounds = array<i64: 1, 4, 256>}, {transform_indices = @transform_1, window_bounds = array<i64: 1, 1, 256>}, {transform_indices = @transform_2, window_bounds = array<i64: 1, 1, 256>}, {transform_indices = @transform_3, window_bounds = array<i64: 1, 4, 3>}]} {
    %c0_i32 = arith.constant 0 : i32
    %0 = arith.cmpi eq, %arg1, %c0_i32 : i32
    %1 = arith.extui %0 : i1 to i32
    %c0_i32_0 = arith.constant 0 : i32
    %2 = arith.cmpi ne, %1, %c0_i32_0 : i32
    scf.if %2 {
      %cst_28 = arith.constant 0.000000e+00 : f32
      %50 = vector.broadcast %cst_28 : f32 to vector<4x1xf32>
      %c0_29 = arith.constant 0 : index
      %c0_30 = arith.constant 0 : index
      %51 = vector.load %arg6[%c0_29, %c0_30] : memref<4x1xf32, #tpu.memory_space<vmem>>, vector<4x1xf32>
      tpu.vector_store %arg6[%c0_29, %c0_30], %50 {strides = array<i32>} : memref<4x1xf32, #tpu.memory_space<vmem>>, vector<4x1xf32>,
      %cst_31 = arith.constant 0.000000e+00 : f32
      %52 = vector.broadcast %cst_31 : f32 to vector<4x1xf32>
      %c0_32 = arith.constant 0 : index
      %c0_33 = arith.constant 0 : index
      %53 = vector.load %arg7[%c0_32, %c0_33] : memref<4x1xf32, #tpu.memory_space<vmem>>, vector<4x1xf32>
      tpu.vector_store %arg7[%c0_32, %c0_33], %52 {strides = array<i32>} : memref<4x1xf32, #tpu.memory_space<vmem>>, vector<4x1xf32>,
      %cst_34 = arith.constant 0.000000e+00 : f32
      %54 = vector.broadcast %cst_34 : f32 to vector<4x1xf32>
      %c0_35 = arith.constant 0 : index
      %c0_36 = arith.constant 0 : index
      %55 = vector.load %arg8[%c0_35, %c0_36] : memref<4x1xf32, #tpu.memory_space<vmem>>, vector<4x1xf32>
      tpu.vector_store %arg8[%c0_35, %c0_36], %54 {strides = array<i32>} : memref<4x1xf32, #tpu.memory_space<vmem>>, vector<4x1xf32>,
    } else {
    }
    %c0 = arith.constant 0 : index
    %c0_1 = arith.constant 0 : index
    %c0_2 = arith.constant 0 : index
    %3 = vector.load %arg2[%c0, %c0_1, %c0_2] : memref<1x4x256xf32, #tpu.memory_space<vmem>>, vector<1x4x256xf32>
    %4 = vector.shape_cast %3 : vector<1x4x256xf32> to vector<4x256xf32>
    %c0_3 = arith.constant 0 : index
    %c0_4 = arith.constant 0 : index
    %c0_5 = arith.constant 0 : index
    %5 = vector.load %arg3[%c0_3, %c0_4, %c0_5] : memref<1x1x256xi8, #tpu.memory_space<vmem>>, vector<1x1x256xi8>
    %6 = vector.shape_cast %5 : vector<1x1x256xi8> to vector<1x256xi8>
    %7 = arith.extsi %6 : vector<1x256xi8> to vector<1x256xi32>
    %cst = arith.constant dense<0xFF800000> : vector<256xf32>
    %8 = vector.multi_reduction <maximumf>, %4, %cst [0] : vector<4x256xf32> to vector<256xf32>
    %9 = vector.shape_cast %8 : vector<256xf32> to vector<1x256xf32>
    %10 = vector.broadcast %9 : vector<1x256xf32> to vector<4x256xf32>
    %11 = arith.subf %4, %10 : vector<4x256xf32>
    %12 = math.exp %11 : vector<4x256xf32>
    %cst_6 = arith.constant dense<0.000000e+00> : vector<256xf32>
    %13 = vector.multi_reduction <add>, %12, %cst_6 [0] : vector<4x256xf32> to vector<256xf32>
    %14 = vector.shape_cast %13 : vector<256xf32> to vector<1x256xf32>
    %15 = vector.broadcast %14 : vector<1x256xf32> to vector<4x256xf32>
    %16 = arith.divf %12, %15 : vector<4x256xf32>
    %17 = math.log %14 : vector<1x256xf32>
    %18 = arith.addf %17, %9 : vector<1x256xf32>
    %19 = tpu.iota {dimensions = array<i32: 0>} : vector<4x256xi32>
    %20 = vector.broadcast %7 : vector<1x256xi32> to vector<4x256xi32>
    %21 = arith.cmpi eq, %19, %20 : vector<4x256xi32>
    %22 = arith.extui %21 : vector<4x256xi1> to vector<4x256xi32>
    %23 = arith.sitofp %22 : vector<4x256xi32> to vector<4x256xf32>
    %24 = arith.mulf %23, %4 : vector<4x256xf32>
    %cst_7 = arith.constant dense<0.000000e+00> : vector<256xf32>
    %25 = vector.multi_reduction <add>, %24, %cst_7 [0] : vector<4x256xf32> to vector<256xf32>
    %26 = vector.shape_cast %25 : vector<256xf32> to vector<1x256xf32>
    %27 = arith.subf %18, %26 : vector<1x256xf32>
    %c0_8 = arith.constant 0 : index
    %c0_9 = arith.constant 0 : index
    %c0_10 = arith.constant 0 : index
    %28 = vector.load %arg4[%c0_8, %c0_9, %c0_10] : memref<1x1x256xf32, #tpu.memory_space<vmem>>, vector<1x1x256xf32>
    %29 = vector.shape_cast %28 : vector<1x1x256xf32> to vector<1x256xf32>
    %30 = vector.shape_cast %27 : vector<1x256xf32> to vector<1x1x256xf32>
    tpu.vector_store %arg4[%c0_8, %c0_9, %c0_10], %30 {strides = array<i32>} : memref<1x1x256xf32, #tpu.memory_space<vmem>>, vector<1x1x256xf32>,
    %c0_11 = arith.constant 0 : index
    %c0_12 = arith.constant 0 : index
    %31 = vector.load %arg7[%c0_11, %c0_12] : memref<4x1xf32, #tpu.memory_space<vmem>>, vector<4x1xf32>
    %cst_13 = arith.constant dense<0.000000e+00> : vector<4xf32>
    %32 = vector.multi_reduction <add>, %16, %cst_13 [1] : vector<4x256xf32> to vector<4xf32>
    %33 = vector.shape_cast %32 : vector<4xf32> to vector<4x1xf32>
    %34 = arith.addf %31, %33 : vector<4x1xf32>
    %c0_14 = arith.constant 0 : index
    %c0_15 = arith.constant 0 : index
    %35 = vector.load %arg7[%c0_14, %c0_15] : memref<4x1xf32, #tpu.memory_space<vmem>>, vector<4x1xf32>
    tpu.vector_store %arg7[%c0_14, %c0_15], %34 {strides = array<i32>} : memref<4x1xf32, #tpu.memory_space<vmem>>, vector<4x1xf32>,
    %c0_16 = arith.constant 0 : index
    %c0_17 = arith.constant 0 : index
    %36 = vector.load %arg6[%c0_16, %c0_17] : memref<4x1xf32, #tpu.memory_space<vmem>>, vector<4x1xf32>
    %37 = arith.mulf %16, %23 : vector<4x256xf32>
    %cst_18 = arith.constant dense<0.000000e+00> : vector<4xf32>
    %38 = vector.multi_reduction <add>, %37, %cst_18 [1] : vector<4x256xf32> to vector<4xf32>
    %39 = vector.shape_cast %38 : vector<4xf32> to vector<4x1xf32>
    %40 = arith.addf %36, %39 : vector<4x1xf32>
    %c0_19 = arith.constant 0 : index
    %c0_20 = arith.constant 0 : index
    %41 = vector.load %arg6[%c0_19, %c0_20] : memref<4x1xf32, #tpu.memory_space<vmem>>, vector<4x1xf32>
    tpu.vector_store %arg6[%c0_19, %c0_20], %40 {strides = array<i32>} : memref<4x1xf32, #tpu.memory_space<vmem>>, vector<4x1xf32>,
    %c0_21 = arith.constant 0 : index
    %c0_22 = arith.constant 0 : index
    %42 = vector.load %arg8[%c0_21, %c0_22] : memref<4x1xf32, #tpu.memory_space<vmem>>, vector<4x1xf32>
    %cst_23 = arith.constant dense<0.000000e+00> : vector<4xf32>
    %43 = vector.multi_reduction <add>, %23, %cst_23 [1] : vector<4x256xf32> to vector<4xf32>
    %44 = vector.shape_cast %43 : vector<4xf32> to vector<4x1xf32>
    %45 = arith.addf %42, %44 : vector<4x1xf32>
    %c0_24 = arith.constant 0 : index
    %c0_25 = arith.constant 0 : index
    %46 = vector.load %arg8[%c0_24, %c0_25] : memref<4x1xf32, #tpu.memory_space<vmem>>, vector<4x1xf32>
    tpu.vector_store %arg8[%c0_24, %c0_25], %45 {strides = array<i32>} : memref<4x1xf32, #tpu.memory_space<vmem>>, vector<4x1xf32>,
    %c0_i32_26 = arith.constant 0 : i32
    %47 = arith.cmpi eq, %arg1, %c0_i32_26 : i32
    %48 = arith.extui %47 : i1 to i32
    %c0_i32_27 = arith.constant 0 : i32
    %49 = arith.cmpi ne, %48, %c0_i32_27 : i32
    scf.if %49 {
      %c0_28 = arith.constant 0 : index
      %c0_29 = arith.constant 0 : index
      %50 = vector.load %arg6[%c0_28, %c0_29] : memref<4x1xf32, #tpu.memory_space<vmem>>, vector<4x1xf32>
      %c0_30 = arith.constant 0 : index
      %c0_31 = arith.constant 0 : index
      %51 = vector.load %arg7[%c0_30, %c0_31] : memref<4x1xf32, #tpu.memory_space<vmem>>, vector<4x1xf32>
      %c0_32 = arith.constant 0 : index
      %c0_33 = arith.constant 0 : index
      %52 = vector.load %arg8[%c0_32, %c0_33] : memref<4x1xf32, #tpu.memory_space<vmem>>, vector<4x1xf32>
      %53 = tpu.concatenate %50, %51, %52 in 1 : vector<4x1xf32>, vector<4x1xf32>, vector<4x1xf32> -> vector<4x3xf32>
      %c0_34 = arith.constant 0 : index
      %c0_35 = arith.constant 0 : index
      %c0_36 = arith.constant 0 : index
      %54 = vector.load %arg5[%c0_34, %c0_35, %c0_36] : memref<1x4x3xf32, #tpu.memory_space<vmem>>, vector<1x4x3xf32>
      %55 = vector.shape_cast %54 : vector<1x4x3xf32> to vector<4x3xf32>
      %56 = vector.shape_cast %53 : vector<4x3xf32> to vector<1x4x3xf32>
      tpu.vector_store %arg5[%c0_34, %c0_35, %c0_36], %56 {strides = array<i32>} : memref<1x4x3xf32, #tpu.memory_space<vmem>>, vector<1x4x3xf32>,
    } else {
    }
    return
  }
  func.func @transform_0(%arg0: i32, %arg1: i32) -> (i32, i32, i32) {
    %c0_i32 = arith.constant 0 : i32
    %c0_i32_0 = arith.constant 0 : i32
    return %arg0, %c0_i32, %arg1 : i32, i32, i32
  }
  func.func @transform_1(%arg0: i32, %arg1: i32) -> (i32, i32, i32) {
    %c0_i32 = arith.constant 0 : i32
    %c0_i32_0 = arith.constant 0 : i32
    return %arg0, %c0_i32, %arg1 : i32, i32, i32
  }
  func.func @transform_2(%arg0: i32, %arg1: i32) -> (i32, i32, i32) {
    %c0_i32 = arith.constant 0 : i32
    %c0_i32_0 = arith.constant 0 : i32
    return %arg0, %c0_i32, %arg1 : i32, i32, i32
  }
  func.func @transform_3(%arg0: i32, %arg1: i32) -> (i32, i32, i32) {
    %c0_i32 = arith.constant 0 : i32
    %c0_i32_0 = arith.constant 0 : i32
    %c0_i32_1 = arith.constant 0 : i32
    return %arg0, %c0_i32, %c0_i32_0 : i32, i32, i32
  }
}

</mosaic_0001>

<bundles_post_ra>
// kernel: tpu_custom_call.1
= control target key start
LH: loop header
LB: loop body
LE: loop exit
PB: predicated region body
PF: predicated region fallthrough
CT: control target
= control target key end

     0   :  { %9 = vsyncpa [#allocation6], 0  ;;  %s996_s0 = inlined_call_operand.hbm [shape: f32[2,4,256], index: 0, kind: input, shape index: {}]   ;;  %s997_s1 = inlined_call_operand.vmem [shape: s8[2,1,256], index: 1, kind: input, shape index: {}]   ;;  %s998_s2 = inlined_call_operand.hbm [shape: f32[2,1,256], index: 2, kind: output, shape index: {0}]   ;;  %s999_s3 = inlined_call_operand.vmem [shape: f32[2,4,3], index: 3, kind: output, shape index: {1}]  }
   0x1   :  { %11 = vsyncpa [#allocation6 + $0x1], 0 }
   0x2   :  { %12 = vsyncpa [#allocation7], 0 }
   0x3   :  { %14 = vsyncpa [#allocation7 + $0x1], 0  ;;  %s816_s12 = smov 0   ;;  %s818_s13 = smov 0  }
   0x4   :  { %s820_s14 = smov 0   ;;  %s822_s15 = smov 0  }
   0x5   :  { %s824_s16 = smov 0   ;;  %s826_s17 = smov 0  }
   0x6 LB: > { %s584_s18 = sadd.s32 4294967295, %s788_s17   ;;  %s585_s19 = sadd.s32 4294967294, %s788_s17   ;;  %s788_s17 = sphi %s826_s17, %s20_s17   ;;  %s784_s16 = sphi %s824_s16, %s1011_s16   ;;  %s780_s15 = sphi %s822_s15, %s1010_s15   ;;  %s776_s14 = sphi %s820_s14, %s1009_s14   ;;  %s772_s13 = sphi %s818_s13, %s1008_s13   ;;  %s768_s12 = sphi %s816_s12, %s1007_s12  }
   0x7   : > { %s32_s20 = sadd.s32 1, %s784_s16  ;;  %s41_s21 = sadd.s32 1, %s776_s14 }
   0x8   : > { %p34_p0 = scmp.ge.s32.totalorder %s32_s20, 2  ;;  %p48_p1 = scmp.ne.s32.totalorder %s776_s14, %s772_s13 }
   0x9   : > { %p49_p2 = scmp.eq.s32.totalorder %s788_s17, 0  ;;  %p54_p3 = scmp.ne.s32.totalorder %s772_s13, %s768_s12 }
   0xa   : > { %s1013_s20 = smov (%p34_p0, %s32_s20), 0  ;;  %p55_p5 = scmp.eq.s32.totalorder %s584_s18, 0 }
   0xb   : > { %p857_p4 = por %p49_p2, %p48_p1  ;;  %s36_s23 = ssub.s32 %s784_s16, %s1013_s20 }
   0xc   : > { %p108_p6 = scmp.eq.s32.totalorder %s584_s18, 1  ;;  %p39_p7 = scmp.eq.s32.totalorder %s36_s23, 0 }
   0xd   : > { %p863_p8 = por %p55_p5, %p54_p3  ;;  %p114_p10 = scmp.eq.s32.totalorder %s585_s19, 1 }
   0xe   : > { %p867_p9 = por %p108_p6, %p48_p1  ;;  %p617_p13 = scmp.lt.s32.totalorder %s788_s17, 2 }
   0xf   : > { %s872_s26 = scalar_select %p39_p7, %s776_s14, %s41_s21  }
  0x10   : > { %p874_p11 = por %p114_p10, %p54_p3  ;;  %s160_s28 = sand.u32 1, %s776_s14  }
  0x11   : > { %s588_s29 = sshll.u32 %s160_s28, 3  ;;  %s603_s30 = sshll.u32 %s784_s16, 7 }
  0x12   : > { %s1003_s27 = scalar_select %p874_p11, 1, 0 }
  0x13   : > { %s172_s6 = scalar_lea.hbm %s996_s0, %s603_s30  ;;  %s164_s7 = scalar_lea.vmem [#allocation5], %s588_s29 }
  0x14   : > { %s174_s8 = sshll.u32 %s164_s7, 4  ;;  %p887_p0 = pnand %p617_p13, %p857_p4  ;;  %s175_s8 = int_to_ptr.vmem [resolvable:$true] %s174_s8 }
  0x15   : > { %p591_p1 = scmp.ge.s32.totalorder %s788_s17, 1  ;;  %p191_p2 = scmp.lt.s32.totalorder %s788_s17, 3 }
  0x16   : > { %s161_s10 = scalar_lea.sflag [#allocation6], %s160_s28  ;;  %p682_p3 = pneg %p887_p0 }
  0x17   : > { %s693_s11 = scalar_lea.vmem %s175_s8, 128  ;;  %s790_s18 = smov [#allocation5]  }
  0x18   : > { %p694_p5 = scmp.ne.s32.totalorder %s175_s8, %s693_s11  ;;  %s698_s19 = sshll.u32 %s790_s18, 4  ;;  %s699_s19 = int_to_ptr.vmem [resolvable:$false] %s698_s19 }
  0x19   : > { %s700_s21 = scalar_lea.vmem %s699_s19, 256  ;;  %p701_p10 = scmp.lt.s32.totalorder %s175_s8, %s699_s19 }
  0x1a   : > { %p696_p6 = pnand %p694_p5, %p682_p3  ;;  %p702_p12 = scmp.lt.s32.totalorder %s700_s21, %s693_s11 }
  0x1c   : > { %p697_p7 = pneg %p696_p6  ;;  %p703_p4 = por %p702_p12, %p701_p10 }
  0x1e   : > { %p704_p13 = pnand %p703_p4, %p697_p7 }
  0x20   : > { %707 = shalt.err (!%p704_p13)
}
  0x21   : > { %612 = dma.hbm_to_vmem [thread:$0]  (!%p887_p0), %s172_s6, 128, %s175_s8, %s161_s10  }
  0x22   : > { %p192_p11 = pnand %p591_p1, %p191_p2 }
  0x23   : > { %s902_s22 = sand.u32 (!%p192_p11), 1, %s772_s13  }
  0x24   : > { %195 = sbr.rel (%p192_p11) target bundleno = 396 (0x18c), region = 28  ;;  %s592_s23 = sshll.u32 (!%p192_p11), %s902_s22, 3 }
  0x25   : > { %s198_s28 = scalar_lea.sflag (!%p192_p11), [#allocation6], %s902_s22  ;;  %s201_s29 = scalar_lea.vmem (!%p192_p11), [#allocation5], %s592_s23 }
  0x29   : > { %759 = dma.done.wait (%p863_p8), %s198_s28, 128  }
  0x2a   : > { %761 = vsyncadd (%p863_p8), %s198_s28, 4294967168  ;;  %p238_p12 = scmp.lt.s32.totalorder %s780_s15, 1  ;;  %v316_v0 = vlaneseq  ;;  %vm255_vm0 = vcmask 3072   ;;  %v791_v1 = vmov 0.0   ;;  %vm265_vm1 = vcmask 1043456   ;;  %v259_v5 = vld [vmem:[%s201_s29] sm:$0xff] }
  0x2b   : > { %257 = vst.msk [vmem:[#allocation3] sm:$0xf] %vm255_vm0, %v791_v1  ;;  %256 = vst.msk [vmem:[#allocation2] sm:$0xf] %vm255_vm0, %v791_v1  ;;  %v263_v7 = vcombine.high %v259_v5, %v259_v5  ;;  %v266_v8 = vsel %vm265_vm1, %v259_v5, -inf  ;;  %s593_s7 = sshll.u32 %s902_s22, 1 }
  0x2c   : > { %258 = vst.msk [vmem:[#allocation4] sm:$0xf] %vm255_vm0, %v791_v1  ;;  %s915_s30 = scalar_select %p238_p12, %s780_s15, 1  ;;  %v918_v2 = vshrl.u32 %v316_v0, 7  ;;  %v267_v10 = vrot.slane %v266_v8, 4  ;;  %vm378_vm4 = vcmp.lt.s32.totalorder %v316_v0, 256 }
  0x2d   : > { %v273_v11 = vsel %vm265_vm1, %v263_v7, -inf  ;;  %s604_s8 = sshll.u32 %s780_s15, 5  ;;  %s229_s9 = scalar_lea.vmem [#allocation8], %s593_s7 }
  0x2e   : > { %s594_s24 = sshll.u32 %s915_s30, 1  ;;  %v320_v3 = vsub.s32 0, %v918_v2  ;;  %v324_v4 = vsub.s32 4, %v918_v2  ;;  %v268_v14 = vmax.f32 %v266_v8, %v267_v10  ;;  %v274_v15 = vrot.slane %v273_v11, 4  ;;  %s458_s10 = sshll.u32 %s229_s9, 4  ;;  %s459_s10 = int_to_ptr.vmem [resolvable:$true] %s458_s10 }
  0x2f   : > { %s244_s6 = scalar_lea.vmem %s997_s1, %s594_s24  ;;  %s947_s19 = scalar_lea.hbm %s998_s2, %s604_s8 }
  0x30   : > { %v260_v6 = vld [vmem:[%s244_s6] sm:$0x3]  ;;  %v269_v18 = vrot.slane %v268_v14, 2  ;;  %v275_v19 = vmax.f32 %v273_v11, %v274_v15  ;;  %s438_s21 = scalar_lea.sflag [#allocation7], %s902_s22  ;;  %s708_s23 = scalar_lea.vmem %s459_s10, 32 }
  0x31   : > { %v261_v9 = vunpack.c.0.s8 %v260_v6  ;;  %p709_p8 = scmp.ne.s32.totalorder %s459_s10, %s708_s23  ;;  %s793_s15 = smov [#allocation8]  }
  0x32   : > { %v270_v20 = vmax.f32 %v268_v14, %v269_v18  ;;  %v276_v21 = vrot.slane %v275_v19, 2  ;;  %s712_s28 = sshll.u32 %s793_s15, 4  ;;  %s713_s28 = int_to_ptr.vmem [resolvable:$false] %s712_s28 }
  0x33   : > { %v321_v12 = vrot.slane %v261_v9, %v320_v3  ;;  %v325_v13 = vrot.slane %v261_v9, %v324_v4  ;;  %p710_p11 = pnand %p709_p8, %p867_p9  ;;  %s714_s29 = scalar_lea.vmem %s713_s28, 64 }
  0x34   : > { %v271_v26 = vrot.slane %v270_v20, 1  ;;  %v277_v27 = vmax.f32 %v275_v19, %v276_v21  ;;  %p715_p1 = scmp.lt.s32.totalorder %s459_s10, %s713_s28  ;;  %p716_p2 = scmp.lt.s32.totalorder %s714_s29, %s708_s23 }
  0x35   : > { %v329_v16 = vrot.slane %v321_v12, %v320_v3  ;;  %v333_v17 = vrot.slane %v325_v13, %v320_v3  ;;  %p711_p0 = pneg %p710_p11 }
  0x36   : > { %v272_v28 = vmax.f32 %v270_v20, %v271_v26  ;;  %v278_v29 = vrot.slane %v277_v27, 1  ;;  %p717_p3 = por %p716_p2, %p715_p1 }
  0x37   : > { %vm334_vm2 = vcmp.eq.s32.totalorder %v918_v2, %v329_v16  ;;  %vm335_vm3 = vcmp.eq.s32.totalorder %v918_v2, %v333_v17 }
  0x38   : > { %v596_v22 = vsel %vm334_vm2, 1.0, %v791_v1  ;;  %v597_v23 = vsel %vm335_vm3, 1.0, %v791_v1  ;;  %v279_v30 = vmax.f32 %v277_v27, %v278_v29  ;;  %p718_p5 = pnand %p717_p3, %p711_p0 }
  0x39   : > { %v340_v24 = vmul.f32 %v596_v22, %v259_v5  ;;  %v341_v25 = vmul.f32 %v597_v23, %v263_v7  ;;  %v396_v8 = vcombine.low %v596_v22, %v597_v23  ;;  %v410_v17 = vsel %vm265_vm1, %v596_v22, 0.0 }
  0x3a   : > { %v282_v31 = vcombine.low %v272_v28, %v279_v30  ;;  %v411_v19 = vsel %vm265_vm1, %v597_v23, 0.0  ;;  %v381_v23 = vld [vmem:[#allocation3] sm:$0xf] }
  0x3b   : > { %v342_v41 = vsel %vm265_vm1, %v340_v24, 0.0  ;;  %v349_v44 = vsel %vm265_vm1, %v341_v25, 0.0  ;;  %v412_v26 = vadd.f32 %v411_v19, %v410_v17 }
  0x3c   : > { %v284_v32 = vsub.f32 %v259_v5, %v282_v31  ;;  %v343_v47 = vrot.slane %v342_v41, 4  ;;  %v350_v50 = vrot.slane %v349_v44, 4 }
  0x3e   : > { %v285_v33 = vmul.f32 1.442695, %v284_v32  ;;  %v344_v53 = vadd.f32 %v343_v47, %v342_v41  ;;  %v351_v55 = vadd.f32 %v350_v50, %v349_v44 }
  0x40   : > { %672 = vpow2.f32 %v285_v33  ;;  %v345_v57 = vrot.slane %v344_v53, 2  ;;  %v352_v58 = vrot.slane %v351_v55, 2 }
  0x42   : > { %v346_v59 = vadd.f32 %v345_v57, %v344_v53  ;;  %v353_v60 = vadd.f32 %v352_v58, %v351_v55 }
  0x44   : > { %v347_v61 = vrot.slane %v346_v59, 1  ;;  %v354_v62 = vrot.slane %v353_v60, 1 }
  0x46   : > { %v348_v3 = vadd.f32 %v347_v61, %v346_v59  ;;  %v355_v7 = vadd.f32 %v354_v62, %v353_v60 }
  0x4d   : > { %v673_v34 = vpop.eup %672 }
  0x4e   : > { %v288_v35 = vcombine.high %v673_v34, %v673_v34  ;;  %v290_v36 = vsel %vm265_vm1, %v673_v34, 0.0 }
  0x4f   : > { %v291_v37 = vrot.slane %v290_v36, 4 }
  0x50   : > { %v297_v38 = vsel %vm265_vm1, %v288_v35, 0.0 }
  0x51   : > { %v292_v39 = vadd.f32 %v291_v37, %v290_v36  ;;  %v298_v40 = vrot.slane %v297_v38, 4  ;;  %v409_v37 = vld [vmem:[#allocation4] sm:$0xf] }
  0x53   : > { %v293_v42 = vrot.slane %v292_v39, 2  ;;  %v299_v43 = vadd.f32 %v298_v40, %v297_v38 }
  0x55   : > { %v294_v45 = vadd.f32 %v293_v42, %v292_v39  ;;  %v300_v46 = vrot.slane %v299_v43, 2 }
  0x57   : > { %v295_v48 = vrot.slane %v294_v45, 1  ;;  %v301_v49 = vadd.f32 %v300_v46, %v299_v43 }
  0x59   : > { %v296_v51 = vadd.f32 %v295_v48, %v294_v45  ;;  %v302_v52 = vrot.slane %v301_v49, 1 }
  0x5b   : > { %v303_v54 = vadd.f32 %v302_v52, %v301_v49  ;;  %674 = vlog2.f32 %v296_v51 }
  0x5d   : > { %v306_v56 = vcombine.low %v296_v51, %v303_v54  ;;  %676 = vlog2.f32 %v303_v54 }
  0x5f   : > { %678 = vrcp.f32 %v306_v56 }
  0x68   : > { %v675_v63 = vpop.eup %674 }
  0x69   : > { %v311_v1 = vmul.f32 0.6931472, %v675_v63 }
  0x6a   : > { %v677_v4 = vpop.eup %676 }
  0x6b   : > { %v313_v5 = vmul.f32 0.6931472, %v677_v4  ;;  %v314_v6 = vadd.f32 %v311_v1, %v272_v28  ;;  %v792_v28 = vmov 1966171168  }
  0x6c   : > { %v679_v9 = vpop.eup %678  ;;  %v362_v29 = vunpack.c.l.s4 %v792_v28 }
  0x6d   : > { %v309_v10 = vmul.f32 %v679_v9, %v673_v34  ;;  %v315_v11 = vadd.f32 %v313_v5, %v279_v30  ;;  %v356_v12 = vsub.f32 %v314_v6, %v348_v3  ;;  %v393_v34 = vld [vmem:[#allocation2] sm:$0xf] }
  0x6e   : > { %v363_v22 = vunpack.c.0.s8 %v362_v29 }
  0x6f   : > { %v383_v13 = vcombine.high %v309_v10, %v309_v10  ;;  %v385_v14 = vsel %vm265_vm1, %v309_v10, 0.0  ;;  %v357_v15 = vsub.f32 %v315_v11, %v355_v7  ;;  %v398_v16 = vmul.f32 %v396_v8, %v309_v10 }
  0x70   : > { %v366_v31 = vsub.s32 %v363_v22, %v918_v2 }
  0x71   : > { %v386_v18 = vsel %vm265_vm1, %v383_v13, 0.0  ;;  %v400_v20 = vcombine.high %v398_v16, %v398_v16  ;;  %v402_v21 = vsel %vm265_vm1, %v398_v16, 0.0  ;;  %v360_v30 = vcombine.low %v356_v12, %v357_v15 }
  0x72   : > { %v387_v24 = vadd.f32 %v386_v18, %v385_v14 }
  0x73   : > { %v403_v25 = vsel %vm265_vm1, %v400_v20, 0.0  ;;  %v367_v32 = vrot.slane %v360_v30, %v366_v31 }
  0x74   : > { %388 = vadd.xlane.f32.xlu0 %v387_v24  ;;  %v404_v27 = vadd.f32 %v403_v25, %v402_v21 }
  0x75   : > { %v374_v35 = vrot.slane %v367_v32, %v366_v31 }
  0x76   : > { %405 = vadd.xlane.f32.xlu1 %v404_v27 }
  0x77   : > { %380 = vst.msk [vmem:[%s229_s9] sm:$0x3] %vm378_vm4, %v374_v35 }
  0x78   : > { %413 = vadd.xlane.f32.xlu0 %v412_v26 }
  0xfd   : > { %v389_v33 = vpop.xlane.xlu0 %388 }
  0xfe   : > { %v390_v36 = vadd.f32 %v389_v33, %v381_v23 }
  0xff   : > { %v406_v38 = vpop.xlane.xlu1 %405 }
 0x100   : > { %392 = vst.msk [vmem:[#allocation3] sm:$0xf] %vm255_vm0, %v390_v36  ;;  %v407_v2 = vadd.f32 %v406_v38, %v393_v34 }
 0x101   : > { %v414_v39 = vpop.xlane.xlu0 %413 }
 0x102   : > { %721 = shalt.err (!%p718_p5)
}
 0x103   : > { %s722_s24 = scalar_lea.hbm %s947_s19, 32  ;;  %s726_s5 = scalar_lea.hbm %s998_s2, 64 }
 0x104   : > { %p723_p6 = scmp.ne.s32.totalorder %s947_s19, %s722_s24  ;;  %p727_p4 = scmp.lt.s32.totalorder %s947_s19, %s998_s2 }
 0x105   : > { %p728_p13 = scmp.lt.s32.totalorder %s726_s5, %s722_s24 }
 0x106   : > { %p724_p7 = pnand %p723_p6, %p867_p9 }
 0x107   : > { %p729_p12 = por %p728_p13, %p727_p4 }
 0x108   : > { %p725_p10 = pneg %p724_p7 }
 0x10a   : > { %p730_p8 = pnand %p729_p12, %p725_p10 }
 0x10c   : > { %733 = shalt.err (!%p730_p8)
}
 0x10d   : > { %607 = dma.vmem_to_hbm [thread:$0]  (%p867_p9), %s459_s10, 32, %s947_s19, %s438_s21   ;;  %v415_v0 = vadd.f32 %v414_v39, %v409_v37  ;;  %408 = vst.msk [vmem:[#allocation2] sm:$0xf] %vm255_vm0, %v407_v2  ;;  %v421_v40 = vld [vmem:[#allocation3] sm:$0xf]  ;;  %vm431_vm5 = vcmask 7168  }
 0x10e   : > { %s794_s8 = smov 1   ;;  %s795_s9 = smov 2   ;;  %vm433_vm6 = vcmask 15360   ;;  %vm435_vm7 = vcmask 19456  }
 0x10f   : > { %416 = vst.msk [vmem:[#allocation4] sm:$0xf] %vm255_vm0, %v415_v0  ;;  %424 = vrot.lane.b32.xlu1 %v421_v40, %s794_s8  ;;  %s595_s11 = sshll.u32 %s915_s30, 2 }
 0x110   : > { %s250_s10 = scalar_lea.vmem %s999_s3, %s595_s11 }
 0x114   : > { %v420_v43 = vld [vmem:[#allocation2] sm:$0xf] }
 0x116   : > { %v422_v41 = vld [vmem:[#allocation4] sm:$0xf] }
 0x117   : > { %428 = vrot.lane.b32.xlu0 %v422_v41, %s795_s9 }
 0x181   : > { %v425_v42 = vpop.permute.xlu1 %424 }
 0x182   : > { %v432_v44 = vsel %vm431_vm5, %v420_v43, %v425_v42 }
 0x189   : > { %v429_v45 = vpop.permute.xlu0 %428 }
 0x18a   : > { %v434_v46 = vsel %vm433_vm6, %v432_v44, %v429_v45 }
 0x18b   : > { %436 = vst.msk [vmem:[%s250_s10] sm:$0xf] %vm435_vm7, %v434_v46 }
 0x18c PF: > { %s473_s19 = sand.u32 1, %s768_s12   ;;  %p1005_p9 = scmp.ne.s32.totalorder %s1003_s27, 0 }
 0x18d   : > { %p1006_p11 = scmp.ge.s32.totalorder %s788_s17, 2  ;;  %s474_s30 = scalar_lea.sflag [#allocation7], %s473_s19 }
 0x18f   : > { %p614_p0 = pnand %p1006_p11, %p1005_p9 }
 0x191   : > { %p615_p1 = pneg %p614_p0 }
 0x193   : > { %763 = dma.done.wait (%p615_p1), %s474_s30, 32  }
 0x194   : > { %765 = vsyncadd (%p615_p1), %s474_s30, 4294967264  ;;  %s20_s17 = sadd.s32 1, %s788_s17   ;;  %s1007_s12 = smov %s772_s13 }
 0x195   : > { %p17_p2 = scmp.ge.s32.totalorder %s20_s17, 4   ;;  %s1008_s13 = smov %s776_s14 }
 0x196   : > { %s1009_s14 = smov %s872_s26  ;;  %s1010_s15 = smov %s784_s16 }
 0x197   : > { %s1011_s16 = smov %s1013_s20  ;;  %19 = sbr.rel (!%p17_p2) target bundleno = 6 (0x6), region = 96 }
 0x19c   :  { %486 = vsyncpa [#allocation6], 1 }
 0x19d   :  { %488 = vsyncpa [#allocation6 + $0x1], 1 }
 0x19e   :  { %489 = vsyncpa [#allocation7], 1 }
 0x19f   :  { %491 = vsyncpa [#allocation7 + $0x1], 1 }

</bundles_post_ra>
